<compile_context>
chip_gen: v7x
topology: tpu7x:2x2x1
jax: 0.10.0
libtpu: 0.0.40
codegen_flags: <defaults>
</compile_context>

<pallas_src>
import functools

import jax
import jax.numpy as jnp
from jax import lax
from jax.experimental import pallas as pl
from jax.experimental.pallas import tpu as pltpu


# ----------------------------------------------------------------------------
# Pallas kernel: pooled reductions -> fused projection -> norm -> similarity
# ----------------------------------------------------------------------------
def _clap_kernel(scale_ref,          # SMEM (1,) f32 : log logit scale
                 audio_ref,          # VMEM (B, tt, D) bf16 : one time tile
                 ids_ref,            # VMEM (B, L) int32      (grid-resident)
                 mask_ref,           # VMEM (B, L) f32        (grid-resident)
                 emb_ref,            # VMEM (V, D) f32        (grid-resident)
                 w_ref,              # VMEM (D, 2P) f32  fused [w_audio | w_text]
                 b_ref,              # VMEM (1, 2P) f32  fused [b_audio | b_text]
                 audio_emb_ref,      # out  (B, P) f32
                 text_emb_ref,       # out  (B, P) f32
                 logits_ref,         # out  (B, LOGITS_PAD) f32 (lane-dense slab)
                 acc_ref,            # scratch VMEM (B, D) f32 : running time-sum
                 *, batch, d_proj, vocab, inv_frames, logits_pad):
    t = pl.program_id(0)
    nt = pl.num_programs(0)

    # ---- init accumulator on the first time tile ---------------------------
    @pl.when(t == 0)
    def _():
        acc_ref[...] = jnp.zeros_like(acc_ref)

    # ---- partial sum over this time tile (bf16 load, f32 accumulate) -------
    acc_ref[...] += jnp.sum(audio_ref[...].astype(jnp.float32), axis=1)

    # ---- finalize on the last tile ------------------------------------------
    @pl.when(t == nt - 1)
    def _():
        # audio mean pool (divide by the TRUE frame count, not the padded one)
        a_pool = acc_ref[...] * inv_frames                           # (B, D)

        # text: embedding gather + masked mean pool as ONE MXU matmul.
        # bag[b, v] = sum_l mask[b, l] * (ids[b, l] == v)
        ids = ids_ref[...]                                           # (B, L)
        mask = mask_ref[...]                                         # (B, L)
        b_, l_ = ids.shape
        onehot = (ids[:, :, None] ==
                  lax.broadcasted_iota(jnp.int32, (b_, l_, vocab), 2)
                  ).astype(jnp.float32)                              # (B, L, V)
        bag = jnp.sum(onehot * mask[:, :, None], axis=1)             # (B, V)
        denom = jnp.maximum(jnp.sum(mask, axis=1, keepdims=True), 1.0)
        t_pool = jnp.dot(bag, emb_ref[...],
                         preferred_element_type=jnp.float32) / denom  # (B, D)

        # fused projection: one taller matmul instead of two tiny ones
        pooled = jnp.concatenate([a_pool, t_pool], axis=0)           # (2B, D)
        proj = jnp.dot(pooled, w_ref[...],
                       preferred_element_type=jnp.float32) + b_ref[...]  # (2B, 2P)
        a_proj = proj[:batch, :d_proj]                               # (B, P)
        t_proj = proj[batch:, d_proj:]                               # (B, P)

        # L2 normalize with rsqrt on the EUP (F.normalize semantics:
        # x / max(||x||, eps)  ==  x * rsqrt(max(||x||^2, eps^2)) )
        eps_sq = 1e-24
        a_emb = a_proj * lax.rsqrt(
            jnp.maximum(jnp.sum(a_proj * a_proj, axis=-1, keepdims=True), eps_sq))
        t_emb = t_proj * lax.rsqrt(
            jnp.maximum(jnp.sum(t_proj * t_proj, axis=-1, keepdims=True), eps_sq))

        audio_emb_ref[...] = a_emb
        text_emb_ref[...] = t_emb

        # similarity: contract dim 1 of both operands (no transpose / XLU copy)
        scale = jnp.minimum(jnp.exp(scale_ref[0]), 100.0)            # CLAP clamp
        logits = scale * lax.dot_general(
            a_emb, t_emb, (((1,), (1,)), ((), ())),
            preferred_element_type=jnp.float32)                      # (B, B)

        # lane-dense store: write a (B, logits_pad) slab, slice in the wrapper
        if logits_pad > batch:
            pad = jnp.zeros((batch, logits_pad - batch), jnp.float32)
            logits_ref[...] = jnp.concatenate([logits, pad], axis=-1)
        else:
            logits_ref[...] = logits


def _pick_time_tile(n_frames, batch, d_audio, *, itemsize=2, budget_bytes=4 << 20):
    """Largest multiple-of-8 divisor of the time axis whose bf16 tile fits the
    per-buffer VMEM budget (double-buffered by the pipeline)."""
    candidates = [tt for tt in range(8, n_frames + 1, 8) if n_frames % tt == 0]
    if not candidates:
        return n_frames                     # tiny/odd time axis: one full block
    fitting = [tt for tt in candidates
               if batch * tt * d_audio * itemsize <= budget_bytes]
    return max(fitting) if fitting else min(candidates)


def _run_clap_kernel(log_scale, audio, ids, mask, emb_table, w_cat, b_cat,
                     *, d_proj, time_tile=None):
    B, Ta, Da = audio.shape
    V, Dt = emb_table.shape
    L = ids.shape[1]
    assert Da == Dt, "fused projection requires d_audio == d_text"
    if time_tile is None:
        time_tile = _pick_time_tile(Ta, B, Da)
    assert Ta % time_tile == 0, "time axis must divide the time tile"
    nt = Ta // time_tile
    P = d_proj
    logits_pad = max(128, ((B + 127) // 128) * 128)   # lane-dense logits slab

    kernel = functools.partial(
        _clap_kernel, batch=B, d_proj=P, vocab=V,
        inv_frames=1.0 / Ta, logits_pad=logits_pad)

    grid_spec = pltpu.PrefetchScalarGridSpec(
        num_scalar_prefetch=0,
        grid=(nt,),                                             # time reduction
        in_specs=[
            pl.BlockSpec(memory_space=pltpu.MemorySpace.SMEM),  # log logit scale
            pl.BlockSpec((B, time_tile, Da), lambda t: (0, t, 0)),  # audio tile
            pl.BlockSpec((B, L), lambda t: (0, 0)),             # token ids (resident)
            pl.BlockSpec((B, L), lambda t: (0, 0)),             # attn mask (resident)
            pl.BlockSpec((V, Dt), lambda t: (0, 0)),            # emb table (resident)
            pl.BlockSpec((Da, 2 * P), lambda t: (0, 0)),        # fused proj weight
            pl.BlockSpec((1, 2 * P), lambda t: (0, 0)),         # fused proj bias
        ],
        out_specs=[
            pl.BlockSpec((B, P), lambda t: (0, 0)),             # audio embeddings
            pl.BlockSpec((B, P), lambda t: (0, 0)),             # text embeddings
            pl.BlockSpec((B, logits_pad), lambda t: (0, 0)),    # padded logits slab
        ],
        scratch_shapes=[pltpu.VMEM((B, Da), jnp.float32)],      # time-sum accumulator
    )

    audio_emb, text_emb, logits_slab = pl.pallas_call(
        kernel,
        out_shape=(
            jax.ShapeDtypeStruct((B, P), jnp.float32),
            jax.ShapeDtypeStruct((B, P), jnp.float32),
            jax.ShapeDtypeStruct((B, logits_pad), jnp.float32),
        ),
        grid_spec=grid_spec,
        compiler_params=pltpu.CompilerParams(
            dimension_semantics=("arbitrary",),  # time axis is a reduction
        ),
    )(log_scale, audio, ids, mask, emb_table, w_cat, b_cat)

    return audio_emb, text_emb, logits_slab[:, :B]


# ----------------------------------------------------------------------------
# Synthetic CLAP model + trace wrapper (mirrors the PyTorch class semantics)
# ----------------------------------------------------------------------------
class SyntheticCLAP:
    """Deterministic, parameterized synthetic CLAP model."""

    def __init__(self, *, d_audio=128, d_text=128, d_proj=128, vocab=128,
                 time_tile=None):
        assert d_audio == d_text
        key = jax.random.PRNGKey(42)
        k1, k2, k3 = jax.random.split(key, 3)
        self.emb_table = jax.random.normal(k1, (vocab, d_text), jnp.float32) * 0.02
        self.w_audio = jax.random.normal(k2, (d_audio, d_proj), jnp.float32) * 0.05
        self.b_audio = jnp.zeros((d_proj,), jnp.float32)
        self.w_text = jax.random.normal(k3, (d_text, d_proj), jnp.float32) * 0.05
        self.b_text = jnp.zeros((d_proj,), jnp.float32)
        # log logit scale, as in CLIP/CLAP (exp'd and clamped inside the kernel)
        self.log_scale = jnp.array([jnp.log(1.0 / 0.07)], jnp.float32)
        # host-side, once: fused projection weight / bias for the single tall matmul
        self.w_cat = jnp.concatenate([self.w_audio, self.w_text], axis=1)    # (D, 2P)
        self.b_cat = jnp.concatenate([self.b_audio, self.b_text])[None, :]   # (1, 2P)
        self.d_proj = d_proj
        self.time_tile = time_tile

    def __call__(self, audio, text_input):
        token_ids = text_input["input_ids"].astype(jnp.int32)            # [B, L]
        if "attention_mask" in text_input and text_input["attention_mask"] is not None:
            mask = text_input["attention_mask"].astype(jnp.float32)
        else:
            mask = jnp.ones(token_ids.shape, jnp.float32)
        # bf16 at the kernel boundary: halves HBM->VMEM traffic on the big tensor;
        # accumulation / normalization / outputs stay f32 inside the kernel.
        audio_bf16 = audio.astype(jnp.bfloat16)
        return _run_clap_kernel(self.log_scale, audio_bf16, token_ids, mask,
                                self.emb_table, self.w_cat, self.b_cat,
                                d_proj=self.d_proj, time_tile=self.time_tile)


class CLAPTraceWrapper:
    """JAX equivalent of the PyTorch CLAPTraceWrapper (inference only)."""

    def __init__(self, clap_model, token_keys):
        self.clap = clap_model
        self.keys = token_keys

    def __call__(self, audio, token1, token2=None):
        # torch.no_grad is implicit: no gradients are taken anywhere here.
        if token2 is not None:
            text_input = {self.keys[0]: token1, self.keys[1]: token2}
        else:
            text_input = {self.keys[0]: token1}
        return self.clap(audio, text_input)


# ----------------------------------------------------------------------------
if __name__ == "__main__":
    B, T_A, D = 2, 32, 128       # audio: batch, time frames, per-frame feature
    L, VOCAB, P = 8, 128, 128    # text : seq len, vocab size, projection dim

    key = jax.random.PRNGKey(0)
    ka, kt, km = jax.random.split(key, 3)
    audio = jax.random.normal(ka, (B, T_A, D), jnp.float32)
    token1 = jax.random.randint(kt, (B, L), 0, VOCAB, jnp.int32)        # input_ids
    token2 = (jax.random.uniform(km, (B, L)) > 0.3).astype(jnp.int32)   # attn mask

    # time_tile=8 forced here so the small demo still exercises the multi-step
    # pipelined time reduction; leave time_tile=None in production to auto-pick
    # the largest VMEM-fitting tile.
    model = CLAPTraceWrapper(
        SyntheticCLAP(d_audio=D, d_text=D, d_proj=P, vocab=VOCAB, time_tile=8),
        token_keys=("input_ids", "attention_mask"))

    audio_emb, text_emb, logits = model(audio, token1, token2)
    jax.block_until_ready((audio_emb, text_emb, logits))

    assert audio_emb.shape == (B, P)
    assert text_emb.shape == (B, P)
    assert logits.shape == (B, B)
    print("KERNEL_OK")
</pallas_src>

<mosaic_0001>
module attributes {stable_mosaic.version = 11 : i64} {
  func.func @_clap_kernel(%arg0: i32, %arg1: memref<1xf32, #tpu.memory_space<smem>>, %arg2: memref<2x8x128xbf16, #tpu.memory_space<vmem>>, %arg3: memref<2x8xi32, #tpu.memory_space<vmem>>, %arg4: memref<2x8xf32, #tpu.memory_space<vmem>>, %arg5: memref<128x128xf32, #tpu.memory_space<vmem>>, %arg6: memref<128x256xf32, #tpu.memory_space<vmem>>, %arg7: memref<1x256xf32, #tpu.memory_space<vmem>>, %arg8: memref<2x128xf32, #tpu.memory_space<vmem>>, %arg9: memref<2x128xf32, #tpu.memory_space<vmem>>, %arg10: memref<2x128xf32, #tpu.memory_space<vmem>>, %arg11: memref<2x128xf32, #tpu.memory_space<vmem>>) attributes {dimension_semantics = [#tpu.dimension_semantics<arbitrary>], iteration_bounds = array<i64: 4>, scalar_prefetch = 0 : i64, scratch_operands = 1 : i64, tpu.core_type = #tpu.core_type<tc>, window_params = [{transform_indices = @transform_0, window_bounds = array<i64: 1>}, {transform_indices = @transform_1, window_bounds = array<i64: 2, 8, 128>}, {pipeline_mode = #tpu.pipeline_mode<synchronous>, transform_indices = @transform_2, window_bounds = array<i64: 2, 8>}, {pipeline_mode = #tpu.pipeline_mode<synchronous>, transform_indices = @transform_3, window_bounds = array<i64: 2, 8>}, {pipeline_mode = #tpu.pipeline_mode<synchronous>, transform_indices = @transform_4, window_bounds = array<i64: 128, 128>}, {pipeline_mode = #tpu.pipeline_mode<synchronous>, transform_indices = @transform_5, window_bounds = array<i64: 128, 256>}, {pipeline_mode = #tpu.pipeline_mode<synchronous>, transform_indices = @transform_6, window_bounds = array<i64: 1, 256>}, {pipeline_mode = #tpu.pipeline_mode<synchronous>, transform_indices = @transform_7, window_bounds = array<i64: 2, 128>}, {pipeline_mode = #tpu.pipeline_mode<synchronous>, transform_indices = @transform_8, window_bounds = array<i64: 2, 128>}, {pipeline_mode = #tpu.pipeline_mode<synchronous>, transform_indices = @transform_9, window_bounds = array<i64: 2, 128>}]} {
    %c0_i32 = arith.constant 0 : i32
    %0 = arith.cmpi eq, %arg0, %c0_i32 : i32
    %1 = arith.extui %0 : i1 to i32
    %c0_i32_0 = arith.constant 0 : i32
    %2 = arith.cmpi ne, %1, %c0_i32_0 : i32
    scf.if %2 {
      %cst_8 = arith.constant 0.000000e+00 : f32
      %12 = vector.broadcast %cst_8 : f32 to vector<2x128xf32>
      %c0_9 = arith.constant 0 : index
      %c0_10 = arith.constant 0 : index
      %13 = vector.load %arg11[%c0_9, %c0_10] : memref<2x128xf32, #tpu.memory_space<vmem>>, vector<2x128xf32>
      tpu.vector_store %arg11[%c0_9, %c0_10], %12 {strides = array<i32>} : memref<2x128xf32, #tpu.memory_space<vmem>>, vector<2x128xf32>,
    } else {
    }
    %c0 = arith.constant 0 : index
    %c0_1 = arith.constant 0 : index
    %3 = vector.load %arg11[%c0, %c0_1] : memref<2x128xf32, #tpu.memory_space<vmem>>, vector<2x128xf32>
    %c0_2 = arith.constant 0 : index
    %c0_3 = arith.constant 0 : index
    %c0_4 = arith.constant 0 : index
    %4 = vector.load %arg2[%c0_2, %c0_3, %c0_4] : memref<2x8x128xbf16, #tpu.memory_space<vmem>>, vector<2x8x128xbf16>
    %5 = arith.extf %4 : vector<2x8x128xbf16> to vector<2x8x128xf32>
    %cst = arith.constant dense<0.000000e+00> : vector<2x128xf32>
    %6 = vector.multi_reduction <add>, %5, %cst [1] : vector<2x8x128xf32> to vector<2x128xf32>
    %7 = arith.addf %3, %6 : vector<2x128xf32>
    %c0_5 = arith.constant 0 : index
    %c0_6 = arith.constant 0 : index
    %8 = vector.load %arg11[%c0_5, %c0_6] : memref<2x128xf32, #tpu.memory_space<vmem>>, vector<2x128xf32>
    tpu.vector_store %arg11[%c0_5, %c0_6], %7 {strides = array<i32>} : memref<2x128xf32, #tpu.memory_space<vmem>>, vector<2x128xf32>,
    %c3_i32 = arith.constant 3 : i32
    %9 = arith.cmpi eq, %arg0, %c3_i32 : i32
    %10 = arith.extui %9 : i1 to i32
    %c0_i32_7 = arith.constant 0 : i32
    %11 = arith.cmpi ne, %10, %c0_i32_7 : i32
    scf.if %11 {
      %c0_8 = arith.constant 0 : index
      %c0_9 = arith.constant 0 : index
      %12 = vector.load %arg11[%c0_8, %c0_9] : memref<2x128xf32, #tpu.memory_space<vmem>>, vector<2x128xf32>
      %cst_10 = arith.constant 3.125000e-02 : f32
      %13 = vector.broadcast %cst_10 : f32 to vector<2x128xf32>
      %14 = arith.mulf %12, %13 : vector<2x128xf32>
      %c0_11 = arith.constant 0 : index
      %c0_12 = arith.constant 0 : index
      %15 = vector.load %arg3[%c0_11, %c0_12] : memref<2x8xi32, #tpu.memory_space<vmem>>, vector<2x8xi32>
      %c0_13 = arith.constant 0 : index
      %c0_14 = arith.constant 0 : index
      %16 = vector.load %arg4[%c0_13, %c0_14] : memref<2x8xf32, #tpu.memory_space<vmem>>, vector<2x8xf32>
      %17 = vector.shape_cast %15 : vector<2x8xi32> to vector<2x8x1xi32>
      %18 = tpu.iota {dimensions = array<i32: 2>} : vector<2x8x128xi32>
      %19 = vector.broadcast %17 : vector<2x8x1xi32> to vector<2x8x128xi32>
      %20 = arith.cmpi eq, %19, %18 : vector<2x8x128xi32>
      %21 = arith.extui %20 : vector<2x8x128xi1> to vector<2x8x128xi32>
      %22 = arith.sitofp %21 : vector<2x8x128xi32> to vector<2x8x128xf32>
      %23 = vector.shape_cast %16 : vector<2x8xf32> to vector<2x8x1xf32>
      %24 = vector.broadcast %23 : vector<2x8x1xf32> to vector<2x8x128xf32>
      %25 = arith.mulf %22, %24 : vector<2x8x128xf32>
      %cst_15 = arith.constant dense<0.000000e+00> : vector<2x128xf32>
      %26 = vector.multi_reduction <add>, %25, %cst_15 [1] : vector<2x8x128xf32> to vector<2x128xf32>
      %cst_16 = arith.constant dense<0.000000e+00> : vector<2xf32>
      %27 = vector.multi_reduction <add>, %16, %cst_16 [1] : vector<2x8xf32> to vector<2xf32>
      %28 = vector.shape_cast %27 : vector<2xf32> to vector<2x1xf32>
      %cst_17 = arith.constant 1.000000e+00 : f32
      %29 = vector.broadcast %cst_17 : f32 to vector<2x1xf32>
      %30 = arith.maximumf %28, %29 : vector<2x1xf32>
      %c0_18 = arith.constant 0 : index
      %c0_19 = arith.constant 0 : index
      %31 = vector.load %arg5[%c0_18, %c0_19] : memref<128x128xf32, #tpu.memory_space<vmem>>, vector<128x128xf32>
      %cst_20 = arith.constant dense<0.000000e+00> : vector<2x128xf32>
      %32 = tpu.matmul %26, %31, %cst_20 {dimension_numbers = #tpu.dot_dimension_numbers<[1], [0], [0], [1], [0, 0, 1, 1], [], []>} : vector<2x128xf32>, vector<128x128xf32>, vector<2x128xf32> -> vector<2x128xf32>
      %33 = vector.broadcast %30 : vector<2x1xf32> to vector<2x128xf32>
      %34 = arith.divf %32, %33 : vector<2x128xf32>
      %35 = tpu.concatenate %14, %34 in 0 : vector<2x128xf32>, vector<2x128xf32> -> vector<4x128xf32>
      %c0_21 = arith.constant 0 : index
      %c0_22 = arith.constant 0 : index
      %36 = vector.load %arg6[%c0_21, %c0_22] : memref<128x256xf32, #tpu.memory_space<vmem>>, vector<128x256xf32>
      %cst_23 = arith.constant dense<0.000000e+00> : vector<4x256xf32>
      %37 = tpu.matmul %35, %36, %cst_23 {dimension_numbers = #tpu.dot_dimension_numbers<[1], [0], [0], [1], [0, 0, 1, 1], [], []>} : vector<4x128xf32>, vector<128x256xf32>, vector<4x256xf32> -> vector<4x256xf32>
      %c0_24 = arith.constant 0 : index
      %c0_25 = arith.constant 0 : index
      %38 = vector.load %arg7[%c0_24, %c0_25] : memref<1x256xf32, #tpu.memory_space<vmem>>, vector<1x256xf32>
      %39 = vector.broadcast %38 : vector<1x256xf32> to vector<4x256xf32>
      %40 = arith.addf %37, %39 : vector<4x256xf32>
      %41 = vector.extract_strided_slice %40 {offsets = [0, 0], sizes = [2, 128], strides = [1, 1]} : vector<4x256xf32> to vector<2x128xf32>
      %42 = vector.extract_strided_slice %40 {offsets = [2, 128], sizes = [2, 128], strides = [1, 1]} : vector<4x256xf32> to vector<2x128xf32>
      %43 = arith.mulf %41, %41 : vector<2x128xf32>
      %cst_26 = arith.constant dense<0.000000e+00> : vector<2xf32>
      %44 = vector.multi_reduction <add>, %43, %cst_26 [1] : vector<2x128xf32> to vector<2xf32>
      %45 = vector.shape_cast %44 : vector<2xf32> to vector<2x1xf32>
      %cst_27 = arith.constant 1.000000e-24 : f32
      %46 = vector.broadcast %cst_27 : f32 to vector<2x1xf32>
      %47 = arith.maximumf %45, %46 : vector<2x1xf32>
      %48 = math.rsqrt %47 : vector<2x1xf32>
      %49 = vector.broadcast %48 : vector<2x1xf32> to vector<2x128xf32>
      %50 = arith.mulf %41, %49 : vector<2x128xf32>
      %51 = arith.mulf %42, %42 : vector<2x128xf32>
      %cst_28 = arith.constant dense<0.000000e+00> : vector<2xf32>
      %52 = vector.multi_reduction <add>, %51, %cst_28 [1] : vector<2x128xf32> to vector<2xf32>
      %53 = vector.shape_cast %52 : vector<2xf32> to vector<2x1xf32>
      %cst_29 = arith.constant 1.000000e-24 : f32
      %54 = vector.broadcast %cst_29 : f32 to vector<2x1xf32>
      %55 = arith.maximumf %53, %54 : vector<2x1xf32>
      %56 = math.rsqrt %55 : vector<2x1xf32>
      %57 = vector.broadcast %56 : vector<2x1xf32> to vector<2x128xf32>
      %58 = arith.mulf %42, %57 : vector<2x128xf32>
      %c0_30 = arith.constant 0 : index
      %c0_31 = arith.constant 0 : index
      %59 = vector.load %arg8[%c0_30, %c0_31] : memref<2x128xf32, #tpu.memory_space<vmem>>, vector<2x128xf32>
      tpu.vector_store %arg8[%c0_30, %c0_31], %50 {strides = array<i32>} : memref<2x128xf32, #tpu.memory_space<vmem>>, vector<2x128xf32>,
      %c0_32 = arith.constant 0 : index
      %c0_33 = arith.constant 0 : index
      %60 = vector.load %arg9[%c0_32, %c0_33] : memref<2x128xf32, #tpu.memory_space<vmem>>, vector<2x128xf32>
      tpu.vector_store %arg9[%c0_32, %c0_33], %58 {strides = array<i32>} : memref<2x128xf32, #tpu.memory_space<vmem>>, vector<2x128xf32>,
      %c0_34 = arith.constant 0 : index
      %61 = memref.load %arg1[%c0_34] : memref<1xf32, #tpu.memory_space<smem>>
      %62 = math.exp %61 : f32
      %cst_35 = arith.constant 1.000000e+02 : f32
      %63 = arith.minimumf %62, %cst_35 : f32
      %cst_36 = arith.constant dense<0.000000e+00> : vector<2x2xf32>
      %64 = tpu.matmul %50, %58, %cst_36 {dimension_numbers = #tpu.dot_dimension_numbers<[1], [1], [0], [0], [0, 0, 1, 0], [], []>} : vector<2x128xf32>, vector<2x128xf32>, vector<2x2xf32> -> vector<2x2xf32>
      %65 = vector.broadcast %63 : f32 to vector<2x2xf32>
      %66 = arith.mulf %65, %64 : vector<2x2xf32>
      %cst_37 = arith.constant 0.000000e+00 : f32
      %67 = vector.broadcast %cst_37 : f32 to vector<2x126xf32>
      %68 = tpu.concatenate %66, %67 in 1 : vector<2x2xf32>, vector<2x126xf32> -> vector<2x128xf32>
      %c0_38 = arith.constant 0 : index
      %c0_39 = arith.constant 0 : index
      %69 = vector.load %arg10[%c0_38, %c0_39] : memref<2x128xf32, #tpu.memory_space<vmem>>, vector<2x128xf32>
      tpu.vector_store %arg10[%c0_38, %c0_39], %68 {strides = array<i32>} : memref<2x128xf32, #tpu.memory_space<vmem>>, vector<2x128xf32>,
    } else {
    }
    return
  }
  func.func @transform_0(%arg0: i32) -> i32 {
    %c0_i32 = arith.constant 0 : i32
    %c0_i32_0 = arith.constant 0 : i32
    return %c0_i32 : i32
  }
  func.func @transform_1(%arg0: i32) -> (i32, i32, i32) {
    %c0_i32 = arith.constant 0 : i32
    %c0_i32_0 = arith.constant 0 : i32
    %c0_i32_1 = arith.constant 0 : i32
    return %c0_i32, %arg0, %c0_i32_0 : i32, i32, i32
  }
  func.func @transform_2(%arg0: i32) -> (i32, i32) {
    %c0_i32 = arith.constant 0 : i32
    %c0_i32_0 = arith.constant 0 : i32
    %c0_i32_1 = arith.constant 0 : i32
    return %c0_i32, %c0_i32_0 : i32, i32
  }
  func.func @transform_3(%arg0: i32) -> (i32, i32) {
    %c0_i32 = arith.constant 0 : i32
    %c0_i32_0 = arith.constant 0 : i32
    %c0_i32_1 = arith.constant 0 : i32
    return %c0_i32, %c0_i32_0 : i32, i32
  }
  func.func @transform_4(%arg0: i32) -> (i32, i32) {
    %c0_i32 = arith.constant 0 : i32
    %c0_i32_0 = arith.constant 0 : i32
    %c0_i32_1 = arith.constant 0 : i32
    return %c0_i32, %c0_i32_0 : i32, i32
  }
  func.func @transform_5(%arg0: i32) -> (i32, i32) {
    %c0_i32 = arith.constant 0 : i32
    %c0_i32_0 = arith.constant 0 : i32
    %c0_i32_1 = arith.constant 0 : i32
    return %c0_i32, %c0_i32_0 : i32, i32
  }
  func.func @transform_6(%arg0: i32) -> (i32, i32) {
    %c0_i32 = arith.constant 0 : i32
    %c0_i32_0 = arith.constant 0 : i32
    %c0_i32_1 = arith.constant 0 : i32
    return %c0_i32, %c0_i32_0 : i32, i32
  }
  func.func @transform_7(%arg0: i32) -> (i32, i32) {
    %c0_i32 = arith.constant 0 : i32
    %c0_i32_0 = arith.constant 0 : i32
    %c0_i32_1 = arith.constant 0 : i32
    return %c0_i32, %c0_i32_0 : i32, i32
  }
  func.func @transform_8(%arg0: i32) -> (i32, i32) {
    %c0_i32 = arith.constant 0 : i32
    %c0_i32_0 = arith.constant 0 : i32
    %c0_i32_1 = arith.constant 0 : i32
    return %c0_i32, %c0_i32_0 : i32, i32
  }
  func.func @transform_9(%arg0: i32) -> (i32, i32) {
    %c0_i32 = arith.constant 0 : i32
    %c0_i32_0 = arith.constant 0 : i32
    %c0_i32_1 = arith.constant 0 : i32
    return %c0_i32, %c0_i32_0 : i32, i32
  }
}

</mosaic_0001>

<bundles_post_ra>
// kernel: tpu_custom_call.1
= control target key start
LH: loop header
LB: loop body
LE: loop exit
PB: predicated region body
PF: predicated region fallthrough
CT: control target
= control target key end

     0   :  { %s1697_s0 = inlined_call_operand.<no memory space> [shape: f32[1], index: 0, kind: input, shape index: {}]   ;;  %s1698_s1 = inlined_call_operand.hbm [shape: bf16[2,32,128], index: 1, kind: input, shape index: {}]   ;;  %s1699_s2 = inlined_call_operand.vmem [shape: s32[2,8], index: 2, kind: input, shape index: {}]   ;;  %s1700_s3 = inlined_call_operand.vmem [shape: f32[2,8], index: 3, kind: input, shape index: {}]   ;;  %s1701_s4 = inlined_call_operand.hbm [shape: f32[128,128], index: 4, kind: input, shape index: {}]   ;;  %s1702_s5 = inlined_call_operand.hbm [shape: f32[128,256], index: 5, kind: input, shape index: {}]   ;;  %s1703_s6 = inlined_call_operand.vmem [shape: f32[1,256], index: 6, kind: input, shape index: {}]   ;;  %s1704_s7 = inlined_call_operand.hbm [shape: f32[2,128], index: 7, kind: output, shape index: {0}]   ;;  %s1705_s8 = inlined_call_operand.hbm [shape: f32[2,128], index: 8, kind: output, shape index: {1}]   ;;  %s1706_s9 = inlined_call_operand.hbm [shape: f32[2,128], index: 9, kind: output, shape index: {2}]  }
   0x1   :  { %15 = sst [smem:[#allocation3]] %s1697_s0 }
   0x2   :  { %16 = vsyncpa [#allocation5], 0 }
   0x3   :  { %18 = vsyncpa [#allocation5 + $0x1], 0 }
   0x4   :  { %19 = vsyncpa [#allocation8], 0 }
   0x5   :  { %20 = vsyncpa [#allocation6], 0 }
   0x6   :  { %21 = vsyncpa [#allocation12], 0  ;;  %s1414_s11 = smov 0   ;;  %s1416_s12 = smov 0  }
   0x7   :  { %s1418_s13 = smov 0   ;;  %s1420_s14 = smov 0  }
   0x8 LB: > { %s1433_s0 = sadd.s32 4294967295, %s1342_s14   ;;  %s1436_s15 = sadd.s32 1, %s1342_s14   ;;  %s1342_s14 = sphi %s1420_s14, %s1726_s14   ;;  %s1338_s13 = sphi %s1418_s13, %s1730_s13   ;;  %s1334_s12 = sphi %s1416_s12, %s1729_s12   ;;  %s1330_s11 = sphi %s1414_s11, %s1728_s11  }
   0x9   : > { %1713 = sst [smem:[#allocation18_spill]] %s1436_s15  ;;  %s52_s16 = ssub.s32 %s1342_s14, %s1436_s15 }
   0xa   : > { %s55_s17 = sadd.s32 1, %s1338_s13  ;;  %p53_p0 = scmp.eq.s32.totalorder %s52_s16, 0 }
   0xb   : > { %p62_p1 = scmp.ne.s32.totalorder %s1338_s13, %s1334_s12  ;;  %p63_p2 = scmp.eq.s32.totalorder %s1342_s14, 0 }
   0xc   : > { %p68_p3 = scmp.ne.s32.totalorder %s1334_s12, %s1330_s11  ;;  %p1707_p5 = scmp.eq.s32.totalorder %s1433_s0, 0 }
   0xd   : > { %s1446_s18 = scalar_select %p53_p0, %s1338_s13, %s55_s17  }
   0xe   : > { %p1448_p4 = por %p63_p2, %p62_p1  ;;  %p889_p6 = scmp.ge.s32.totalorder %s1342_s14, 1 }
   0xf   : > { %1714 = sst [smem:[#allocation19_spill]] %s1446_s18  ;;  %p247_p7 = scmp.lt.s32.totalorder %s1342_s14, 5 }
  0x10   : > { %p1457_p8 = por %p1707_p5, %p68_p3  ;;  %s1344_s22 = smov [#allocation7]  }
  0x11   : > { %p1462_p10 = pnand %p889_p6, %p247_p7  ;;  %s268_s23 = sshll.u32 %s1344_s22, 4  ;;  %s269_s23 = int_to_ptr.vmem [resolvable:$true] %s268_s23 }
  0x12   : > { %s1716_s20 = scalar_select %p1457_p8, 1, 0 }
  0x13   : > { %s1717_s21 = scalar_select %p1462_p10, 1, 0 }
  0x14   : > { %p1054_p11 = pneg %p1462_p10  ;;  %p1067_p13 = scmp.lt.s32.totalorder %s1342_s14, 4 }
  0x15   : > { %s1132_s28 = scalar_lea.hbm %s1701_s4, 2048 }
  0x16   : > { %p1470_p12 = pnand %p1054_p11, %p1707_p5  ;;  %p1477_p0 = pnand %p1067_p13, %p1448_p4 }
  0x17   : > { %p1133_p1 = scmp.ne.s32.totalorder %s1701_s4, %s1132_s28  ;;  %p1139_p4 = scmp.lt.u32.totalorder %s1132_s28, %s1701_s4 }
  0x18   : > { %s1719_s25 = scalar_select %p1477_p0, 1, 0 }
  0x19   : > { %p1134_p2 = pneg %p1470_p12 }
  0x1b   : > { %p1135_p3 = pnand %p1134_p2, %p1133_p1 }
  0x1d   : > { %p1136_p6 = pneg %p1135_p3 }
  0x1f   : > { %p1141_p7 = pnand %p1139_p4, %p1136_p6 }
  0x21   : > { %1144 = shalt.err (!%p1141_p7)
}
  0x22   : > { %s1145_s16 = scalar_lea.vmem %s269_s23, 2048  ;;  %p1153_p5 = scmp.lt.s32.totalorder %s269_s23, %s269_s23 }
  0x23   : > { %p1146_p11 = scmp.ne.s32.totalorder %s269_s23, %s1145_s16  ;;  %p1154_p8 = scmp.lt.s32.totalorder %s1145_s16, %s1145_s16 }
  0x25   : > { %p1148_p13 = pnand %p1146_p11, %p1134_p2  ;;  %p1155_p10 = por %p1154_p8, %p1153_p5 }
  0x27   : > { %p1149_p9 = pneg %p1148_p13 }
  0x29   : > { %p1156_p0 = pnand %p1155_p10, %p1149_p9 }
  0x2b   : > { %1159 = shalt.err (!%p1156_p0)
}
  0x2c   : > { %s1345_s17 = smov 128   ;;  %s1346_s19 = smov 8  }
  0x2d   : > { %1057 = dma.hbm_to_vmem [thread:$0]  (!%p1470_p12), %s1701_s4, 2048, %s269_s23, [#allocation8], %s1345_s17, %s1345_s17, %s1346_s19  }
  0x2e   : > { %s1347_s27 = smov [#allocation9]   ;;  %s1160_s10 = scalar_lea.hbm %s1702_s5, 4096 }
  0x2f   : > { %s281_s28 = sshll.u32 %s1347_s27, 4  ;;  %p1161_p5 = scmp.ne.s32.totalorder %s1702_s5, %s1160_s10  ;;  %s282_s28 = int_to_ptr.vmem [resolvable:$true] %s281_s28 }
  0x30   : > { %p1167_p10 = scmp.lt.u32.totalorder %s1160_s10, %s1702_s5 }
  0x31   : > { %p1163_p8 = pnand %p1161_p5, %p1134_p2 }
  0x33   : > { %p1164_p9 = pneg %p1163_p8 }
  0x35   : > { %p1169_p0 = pnand %p1167_p10, %p1164_p9 }
  0x37   : > { %1172 = shalt.err (!%p1169_p0)
}
  0x38   : > { %s1173_s23 = scalar_lea.vmem %s282_s28, 4096  ;;  %p1181_p4 = scmp.lt.s32.totalorder %s282_s28, %s282_s28 }
  0x39   : > { %p1174_p1 = scmp.ne.s32.totalorder %s282_s28, %s1173_s23  ;;  %p1182_p7 = scmp.lt.s32.totalorder %s1173_s23, %s1173_s23 }
  0x3b   : > { %p1176_p3 = pnand %p1174_p1, %p1134_p2  ;;  %p1183_p11 = por %p1182_p7, %p1181_p4 }
  0x3d   : > { %p1177_p6 = pneg %p1176_p3 }
  0x3f   : > { %p1184_p13 = pnand %p1183_p11, %p1177_p6 }
  0x41   : > { %1187 = shalt.err (!%p1184_p13)
}
  0x42   : > { %s1348_s17 = smov 256   ;;  %s1349_s15 = smov 16  }
  0x43   : > { %1060 = dma.hbm_to_vmem [thread:$0]  (!%p1470_p12), %s1702_s5, 4096, %s282_s28, [#allocation8], %s1348_s17, %s1348_s17, %s1349_s15  }
  0x44   : > { %s298_s22 = sand.u32 1, %s1338_s13   ;;  %s894_s26 = sshll.u32 %s1342_s14, 6 }
  0x45   : > { %s893_s27 = sshll.u32 %s298_s22, 3  ;;  %s1530_s10 = scalar_lea.hbm %s1698_s1, %s894_s26 }
  0x46   : > { %s302_s11 = scalar_lea.vmem [#allocation4], %s893_s27  ;;  %s1534_s16 = scalar_lea.sflag [#allocation5], %s298_s22 }
  0x47   : > { %s308_s24 = sshll.u32 %s302_s11, 4  ;;  %s1188_s23 = scalar_lea.hbm %s1530_s10, 128  ;;  %s1532_s24 = int_to_ptr.vmem [resolvable:$true] %s308_s24 }
  0x48   : > { %p1189_p12 = scmp.ne.s32.totalorder %s1530_s10, %s1188_s23  ;;  %p1720_p2 = scmp.ne.s32.totalorder %s1719_s25, 0 }
  0x49   : > { %s1193_s15 = scalar_lea.hbm %s1698_s1, 512  ;;  %p1194_p10 = scmp.lt.u32.totalorder %s1530_s10, %s1698_s1 }
  0x4a   : > { %p1190_p5 = pneg %p1720_p2  ;;  %p1195_p0 = scmp.lt.u32.totalorder %s1193_s15, %s1188_s23 }
  0x4b   : > { %p1197_p3 = scmp.lt.u32.totalorder %s1188_s23, %s1530_s10 }
  0x4c   : > { %p1191_p8 = pnand %p1190_p5, %p1189_p12  ;;  %p1196_p1 = por %p1195_p0, %p1194_p10 }
  0x4e   : > { %p1192_p9 = pneg %p1191_p8  ;;  %p1198_p6 = por %p1197_p3, %p1196_p1 }
  0x50   : > { %p1199_p4 = pnand %p1198_p6, %p1192_p9 }
  0x52   : > { %1202 = shalt.err (!%p1199_p4)
}
  0x53   : > { %s1203_s22 = scalar_lea.vmem %s1532_s24, 128  ;;  %s1350_s26 = smov [#allocation4]  }
  0x54   : > { %p1204_p7 = scmp.ne.s32.totalorder %s1532_s24, %s1203_s22  ;;  %s1208_s27 = sshll.u32 %s1350_s26, 4  ;;  %s1209_s27 = int_to_ptr.vmem [resolvable:$false] %s1208_s27 }
  0x55   : > { %s1210_s29 = scalar_lea.vmem %s1209_s27, 256  ;;  %p1211_p12 = scmp.lt.s32.totalorder %s1532_s24, %s1209_s27 }
  0x56   : > { %p1206_p11 = pnand %p1204_p7, %p1190_p5  ;;  %p1212_p8 = scmp.lt.s32.totalorder %s1210_s29, %s1203_s22 }
  0x58   : > { %p1207_p13 = pneg %p1206_p11  ;;  %p1213_p10 = por %p1212_p8, %p1211_p12 }
  0x5a   : > { %p1214_p0 = pnand %p1213_p10, %p1207_p13 }
  0x5c   : > { %1217 = shalt.err (!%p1214_p0)
}
  0x5d   : > { %s1351_s30 = smov 64   ;;  %s1352_s11 = smov 4  }
  0x5e   : > { %1064 = dma.hbm_to_vmem [thread:$0]  (!%p1720_p2), %s1530_s10, 128, %s1532_s24, %s1534_s16, %s1348_s17, %s1351_s30, %s1352_s11  }
  0x5f   : > { %p1721_p5 = scmp.ne.s32.totalorder %s1717_s21, 0 }
  0x60   : > { %s322_s23 = sand.u32 (!%p1721_p5), 1, %s1334_s12   ;;  %p1722_p9 = scmp.ne.s32.totalorder (!%p1721_p5), %s1716_s20, 0 }
  0x61   : > { %320 = sbr.rel (%p1721_p5) target bundleno = 1146 (0x47a), region = 48  ;;  %s896_s14 = sshll.u32 (!%p1721_p5), %s322_s23, 3 }
  0x62   : > { %s323_s28 = scalar_lea.sflag (!%p1721_p5), [#allocation5], %s322_s23  ;;  %s326_s15 = scalar_lea.vmem (!%p1721_p5), [#allocation4], %s896_s14 }
  0x68   : > { %1313 = dma.done.wait (%p1722_p9), %s323_s28, 128  }
  0x69   : > { %1315 = vsyncadd (%p1722_p9), %s323_s28, 4294967168  ;;  %p1723_p1 = scmp.eq.s32.totalorder %s1433_s0, 0 }
  0x6b   : > { %1317 = dma.done.wait (%p1723_p1), [#allocation8], 6144   ;;  %p1724_p3 = pmov %p1723_p1 }
  0x6c   : > { %p1725_p2 = scmp.ne.s32.totalorder %s1433_s0, 0 }
  0x6d   : > { %1319 = vsyncadd (%p1724_p3), [#allocation8], 4294961152  ;;  %v1353_v0 = vmov (!%p1725_p2), 0.0  }
  0x6e   : > { %367 = sbr.rel (%p1725_p2) target bundleno = 117 (0x75), region = 64  ;;  %368 = vst [vmem:[#allocation2] sm:$0x3] (!%p1725_p2), %v1353_v0 }
  0x75 PF: > { %v912_v1 = vld [vmem:[%s326_s15] sm:$0xff]   ;;  %vm388_vm0 = vcmask 1041409   ;;  %v369_v14 = vld [vmem:[#allocation2] sm:$0x3]  ;;  %p900_p6 = scmp.ne.s32.totalorder %s1433_s0, 3 }
  0x76   : > { %v913_v2 = vunpack.c.l.bf16 %v912_v1  ;;  %v914_v3 = vunpack.c.h.bf16 %v912_v1  ;;  %v401_v19 = vlaneseq (!%p900_p6)  ;;  %v456_v20 = vld [vmem:[#allocation7] sm:$0xff] (!%p900_p6)  ;;  %v1354_v21 = vmov (!%p900_p6), 0.0|0.0   ;;  %v457_v22 = vld [vmem:[#allocation7 + $0x8] sm:$0xff] (!%p900_p6)  ;;  %v458_v25 = vld [vmem:[#allocation7 + $0x10] sm:$0xff] (!%p900_p6)  ;;  %s685_s16 = sld [smem:[#allocation3]] (!%p900_p6)  ;;  %s1357_s19 = smov (!%p900_p6), 100.0  }
  0x77   : > { %974 = vmatprep.subr.bf16.mxu0 (!%p900_p6), %v1354_v21  ;;  %v975_v24 = vpack.c.bf16 (!%p900_p6), %v457_v22, %v456_v20  ;;  %v459_v26 = vld [vmem:[#allocation7 + $0x18] sm:$0xff] (!%p900_p6)  ;;  %v1355_v27 = vmov (!%p900_p6), 0.0   ;;  %v399_v28 = vld [vmem:[%s1699_s2] sm:$0x3] (!%p900_p6)  ;;  %v460_v35 = vld [vmem:[#allocation7 + $0x20] sm:$0xff] (!%p900_p6)  ;;  %vm1356_vm1 = vmmov (!%p900_p6), 0  }
  0x78   : > { %v374_v4 = vrot.slane %v913_v2, 4  ;;  %v380_v5 = vrot.slane %v914_v3, 4  ;;  %v402_v23 = vshrl.u32 (!%p900_p6), %v401_v19, 7  ;;  %661 = vmatprep.mubr.f32.mxu1 (!%p900_p6), %v1355_v27  ;;  %v1587_v29 = vld [vmem:[%s1700_s3] sm:$0x3] (!%p900_p6)  ;;  %v978_v32 = vpack.c.bf16 (!%p900_p6), %v459_v26, %v458_v25  ;;  %v462_v40 = vld [vmem:[#allocation7 + $0x30] sm:$0xff] (!%p900_p6)  ;;  %966 = vmatprep.mubr.msk.f32.mxu0 (!%p900_p6), %vm1356_vm1, %v1355_v27 }
  0x79   : > { %976 = vmatpush3.bf16.msra.mxu0 (!%p900_p6), %v975_v24  ;;  %v461_v36 = vld [vmem:[#allocation7 + $0x28] sm:$0xff] (!%p900_p6)  ;;  %v463_v41 = vld [vmem:[#allocation7 + $0x38] sm:$0xff] (!%p900_p6)  ;;  %v464_v43 = vld [vmem:[#allocation7 + $0x40] sm:$0xff] (!%p900_p6)  ;;  %vm451_vm2 = vcmask (!%p900_p6), 58368   ;;  %vm551_vm5 = vcmask (!%p900_p6), 1041408   ;;  %vm676_vm6 = vcmask (!%p900_p6), 1043458  }
  0x7a   : > { %v375_v6 = vadd.f32 %v913_v2, %v374_v4  ;;  %v381_v7 = vadd.f32 %v914_v3, %v380_v5  ;;  %v1589_v30 = vsub.s32 (!%p900_p6), 0, %v402_v23  ;;  %v1591_v31 = vsub.s32 (!%p900_p6), 1, %v402_v23  ;;  %977 = vmatprep.subr.bf16.mxu0 (!%p900_p6), %v1354_v21  ;;  %v465_v44 = vld [vmem:[#allocation7 + $0x48] sm:$0xff] (!%p900_p6)  ;;  %v466_v45 = vld [vmem:[#allocation7 + $0x50] sm:$0xff] (!%p900_p6)  ;;  %v467_v46 = vld [vmem:[#allocation7 + $0x58] sm:$0xff] (!%p900_p6) }
  0x7b   : > { %v981_v39 = vpack.c.bf16 (!%p900_p6), %v461_v36, %v460_v35  ;;  %v984_v42 = vpack.c.bf16 (!%p900_p6), %v463_v41, %v462_v40  ;;  %v554_v47 = vld [vmem:[#allocation9 + $0x8] sm:$0xff] (!%p900_p6)  ;;  %v556_v48 = vld [vmem:[#allocation9 + $0x18] sm:$0xff] (!%p900_p6)  ;;  %v553_v49 = vld [vmem:[#allocation9] sm:$0xff] (!%p900_p6)  ;;  %v987_v50 = vpack.c.bf16 (!%p900_p6), %v465_v44, %v464_v43  ;;  %v990_v62 = vpack.c.bf16 (!%p900_p6), %v467_v46, %v466_v45 }
  0x7c   : > { %v376_v8 = vrot.slane %v375_v6, 2  ;;  %v382_v9 = vrot.slane %v381_v7, 2  ;;  %v404_v33 = vrot.slane (!%p900_p6), %v399_v28, %v1589_v30  ;;  %v426_v34 = vrot.slane (!%p900_p6), %v1587_v29, %v1589_v30  ;;  %v555_v52 = vld [vmem:[#allocation9 + $0x10] sm:$0xff] (!%p900_p6)  ;;  %v558_v53 = vld [vmem:[#allocation9 + $0x28] sm:$0xff] (!%p900_p6)  ;;  %v560_v54 = vld [vmem:[#allocation9 + $0x38] sm:$0xff] (!%p900_p6) }
  0x7d   : > { %v411_v37 = vrot.slane (!%p900_p6), %v399_v28, %v1591_v31  ;;  %v433_v38 = vrot.slane (!%p900_p6), %v1587_v29, %v1591_v31  ;;  %979 = vmatpush3.bf16.msra.mxu0 (!%p900_p6), %v978_v32  ;;  %v998_v51 = vpack.c.bf16 (!%p900_p6), %v556_v48, %v554_v47  ;;  %v1000_v55 = vpack.c.bf16 (!%p900_p6), %v555_v52, %v553_v49  ;;  %v557_v57 = vld [vmem:[#allocation9 + $0x20] sm:$0xff] (!%p900_p6)  ;;  %v559_v58 = vld [vmem:[#allocation9 + $0x30] sm:$0xff] (!%p900_p6)  ;;  %v562_v59 = vld [vmem:[#allocation9 + $0x48] sm:$0xff] (!%p900_p6) }
  0x7e   : > { %v377_v10 = vadd.f32 %v376_v8, %v375_v6  ;;  %v383_v11 = vadd.f32 %v382_v9, %v381_v7  ;;  %406 = vbcast.lane.b32.xlu0 (!%p900_p6), %v404_v33, 256  ;;  %428 = vbcast.lane.b32.xlu1 (!%p900_p6), %v426_v34, 256  ;;  %v1002_v56 = vpack.c.bf16 (!%p900_p6), %v560_v54, %v558_v53  ;;  %v564_v60 = vld [vmem:[#allocation9 + $0x58] sm:$0xff] (!%p900_p6)  ;;  %v468_v63 = vld [vmem:[#allocation7 + $0x60] sm:$0xff] (!%p900_p6)  ;;  %v563_v2 = vld [vmem:[#allocation9 + $0x50] sm:$0xff] (!%p900_p6)  ;;  %vm766_vm7 = vcmask (!%p900_p6), 15360  }
  0x7f   : > { %980 = vmatprep.subr.bf16.mxu0 (!%p900_p6), %v1354_v21  ;;  %999 = vmatprep.subr.bf16.mxu1 (!%p900_p6), %v998_v51  ;;  %v1004_v61 = vpack.c.bf16 (!%p900_p6), %v559_v58, %v557_v57  ;;  %v1006_v0 = vpack.c.bf16 (!%p900_p6), %v564_v60, %v562_v59  ;;  %v561_v1 = vld [vmem:[#allocation9 + $0x40] sm:$0xff] (!%p900_p6)  ;;  %v469_v3 = vld [vmem:[#allocation7 + $0x68] sm:$0xff] (!%p900_p6)  ;;  %v568_v5 = vld [vmem:[#allocation9 + $0x78] sm:$0xff] (!%p900_p6) }
  0x80   : > { %v378_v12 = vrot.slane %v377_v10, 1  ;;  %v384_v13 = vrot.slane %v383_v11, 1  ;;  %1001 = vmatpush1.bf16.msra.mxu1 (!%p900_p6), %v1000_v55  ;;  %v566_v4 = vld [vmem:[#allocation9 + $0x68] sm:$0xff] (!%p900_p6)  ;;  %v1008_v6 = vpack.c.bf16 (!%p900_p6), %v563_v2, %v561_v1  ;;  %v993_v7 = vpack.c.bf16 (!%p900_p6), %v469_v3, %v468_v63  ;;  %v565_v9 = vld [vmem:[#allocation9 + $0x60] sm:$0xff] (!%p900_p6)  ;;  %v571_v22 = vld [vmem:[#allocation9 + $0x90] sm:$0xff] (!%p900_p6) }
  0x81   : > { %396 = sbr.rel (%p900_p6) target bundleno = 1075 (0x433), region = 68  ;;  %982 = vmatpush3.bf16.msra.mxu0 (!%p900_p6), %v981_v39  ;;  %1003 = vmatprep.subr.bf16.mxu1 (!%p900_p6), %v1002_v56  ;;  %v1010_v8 = vpack.c.bf16 (!%p900_p6), %v568_v5, %v566_v4  ;;  %v574_v23 = vld [vmem:[#allocation9 + $0xa8] sm:$0xff] (!%p900_p6)  ;;  %v576_v24 = vld [vmem:[#allocation9 + $0xb8] sm:$0xff] (!%p900_p6)  ;;  %v573_v28 = vld [vmem:[#allocation9 + $0xa0] sm:$0xff] (!%p900_p6) }
  0x82   : > { %v379_v15 = vadd.f32 %v378_v12, %v377_v10  ;;  %v385_v16 = vadd.f32 %v384_v13, %v383_v11  ;;  %413 = vbcast.lane.b32.xlu0 (!%p900_p6), %v411_v37, 256  ;;  %435 = vbcast.lane.b32.xlu1 (!%p900_p6), %v433_v38, 256  ;;  %v567_v10 = vld [vmem:[#allocation9 + $0x70] sm:$0xff] (!%p900_p6)  ;;  %v471_v12 = vld [vmem:[#allocation7 + $0x78] sm:$0xff] (!%p900_p6)  ;;  %v1018_v26 = vpack.c.bf16 (!%p900_p6), %v576_v24, %v574_v23  ;;  %v416_v38 = vand.u32 (!%p900_p6), 127, %v401_v19  ;;  %v582_v59 = vld [vmem:[#allocation9 + $0xe8] sm:$0xff] (!%p900_p6) }
  0x83   : > { %983 = vmatprep.subr.bf16.mxu0 (!%p900_p6), %v1354_v21  ;;  %v470_v11 = vld [vmem:[#allocation7 + $0x70] sm:$0xff] (!%p900_p6)  ;;  %v1012_v13 = vpack.c.bf16 (!%p900_p6), %v567_v10, %v565_v9  ;;  %v580_v33 = vld [vmem:[#allocation9 + $0xd8] sm:$0xff] (!%p900_p6)  ;;  %v585_v10 = vld [vmem:[%s1703_s6] sm:$0x3] (!%p900_p6)  ;;  %v686_v23 = vstv (!%p900_p6), %s685_s16 }
  0x84   : > { %v389_v17 = vsel %vm388_vm0, %v385_v16, %v379_v15  ;;  %1005 = vmatpush1.bf16.msra.mxu1 (!%p900_p6), %v1004_v61  ;;  %v452_v15 = vsel (!%p900_p6), %vm451_vm2, %v1587_v29, 0.0  ;;  %v570_v16 = vld [vmem:[#allocation9 + $0x88] sm:$0xff] (!%p900_p6)  ;;  %v575_v32 = vld [vmem:[#allocation9 + $0xb0] sm:$0xff] (!%p900_p6)  ;;  %v577_v29 = vld [vmem:[#allocation9 + $0xc0] sm:$0xff] (!%p900_p6)  ;;  %v687_v24 = vmul.f32 (!%p900_p6), 1.442695, %v686_v23 }
  0x85   : > { %v391_v18 = vadd.f32 %v389_v17, %v369_v14  ;;  %985 = vmatpush3.bf16.msra.mxu0 (!%p900_p6), %v984_v42  ;;  %1007 = vmatprep.subr.bf16.mxu1 (!%p900_p6), %v1006_v0  ;;  %v996_v14 = vpack.c.bf16 (!%p900_p6), %v471_v12, %v470_v11  ;;  %v572_v17 = vld [vmem:[#allocation9 + $0x98] sm:$0xff] (!%p900_p6)  ;;  %v1020_v34 = vpack.c.bf16 (!%p900_p6), %v575_v32, %v573_v28  ;;  %v579_v36 = vld [vmem:[#allocation9 + $0xd0] sm:$0xff] (!%p900_p6) }
  0x86   : > { %986 = vmatprep.subr.bf16.mxu0 (!%p900_p6), %v1354_v21  ;;  %v1014_v20 = vpack.c.bf16 (!%p900_p6), %v572_v17, %v570_v16  ;;  %v1024_v37 = vpack.c.bf16 (!%p900_p6), %v579_v36, %v577_v29  ;;  %v584_v60 = vld [vmem:[#allocation9 + $0xf8] sm:$0xff] (!%p900_p6)  ;;  %v583_v63 = vld [vmem:[#allocation9 + $0xf0] sm:$0xff] (!%p900_p6)  ;;  %v590_v11 = vrot.slane (!%p900_p6), %v585_v10, %v1589_v30  ;;  %v594_v12 = vrot.slane (!%p900_p6), %v585_v10, %v1591_v31 }
  0x87   : > { %392 = vst [vmem:[#allocation2] sm:$0x3] %v391_v18  ;;  %v569_v18 = vld [vmem:[#allocation9 + $0x80] sm:$0xff] (!%p900_p6)  ;;  %v1026_v61 = vpack.c.bf16 (!%p900_p6), %v584_v60, %v582_v59 }
  0x88   : > { %1009 = vmatpush1.bf16.msra.mxu1 %v1008_v6  ;;  %v1016_v25 = vpack.c.bf16 %v571_v22, %v569_v18 }
  0x89   : > { %988 = vmatpush3.bf16.msra.mxu0 %v987_v50  ;;  %1011 = vmatprep.subr.bf16.mxu1 %v1010_v8 }
  0x8a   : > { %989 = vmatprep.subr.bf16.mxu0 %v1354_v21 }
  0x8c   : > { %1013 = vmatpush1.bf16.msra.mxu1 %v1012_v13 }
  0x8d   : > { %991 = vmatpush3.bf16.msra.mxu0 %v990_v62  ;;  %1015 = vmatprep.subr.bf16.mxu1 %v1014_v20  ;;  %v581_v62 = vld [vmem:[#allocation9 + $0xe0] sm:$0xff] }
  0x8e   : > { %992 = vmatprep.subr.bf16.mxu0 %v1354_v21  ;;  %v1028_v0 = vpack.c.bf16 %v583_v63, %v581_v62  ;;  %v397_v4 = vld [vmem:[#allocation2] sm:$0x3] }
  0x8f   : > { %v398_v8 = vmul.f32 0.03125, %v397_v4 }
  0x90   : > { %1017 = vmatpush1.bf16.msra.mxu1 %v1016_v25 }
  0x91   : > { %994 = vmatpush3.bf16.msra.mxu0 %v993_v7  ;;  %1019 = vmatprep.subr.bf16.mxu1 %v1018_v26 }
  0x92   : > { %995 = vmatprep.subr.bf16.mxu0 %v1354_v21  ;;  %v578_v21 = vld [vmem:[#allocation9 + $0xc8] sm:$0xff] }
  0x93   : > { %v1022_v35 = vpack.c.bf16 %v580_v33, %v578_v21 }
  0x94   : > { %1021 = vmatpush1.bf16.msra.mxu1 %v1020_v34 }
  0x95   : > { %997 = vmatpush3.bf16.msra.mxu0 %v996_v14  ;;  %1023 = vmatprep.subr.bf16.mxu1 %v1022_v35 }
  0x96   : > { %969 = vmatprep.subr.mxu0 %v1355_v27 }
  0x98   : > { %1025 = vmatpush1.bf16.msra.mxu1 %v1024_v37 }
  0x99   : > { %1027 = vmatprep.subr.bf16.mxu1 %v1026_v61 }
  0x9c   : > { %1029 = vmatpush1.bf16.msra.mxu1 %v1028_v0 }
  0xa1   : > { %453 = vadd.xlane.f32.xlu0 %v452_v15 }
  0xf0   : > { %v407_v39 = vpop.permute.xlu0 %406  ;;  %v429_v40 = vpop.permute.xlu1 %428 }
  0xf1   : > { %vm417_vm3 = vcmp.eq.s32.totalorder %v407_v39, %v416_v38 }
  0xf2   : > { %v901_v41 = vsel %vm417_vm3, 1.0, %v1355_v27 }
  0xf3   : > { %v437_v42 = vmul.f32 %v901_v41, %v429_v40 }
  0xf4   : > { %v414_v43 = vpop.permute.xlu0 %413  ;;  %v436_v44 = vpop.permute.xlu1 %435 }
  0xf5   : > { %v439_v45 = vrot.slane %v437_v42, 4  ;;  %vm418_vm4 = vcmp.eq.s32.totalorder %v414_v43, %v416_v38 }
  0xf6   : > { %v902_v46 = vsel %vm418_vm4, 1.0, %v1355_v27 }
  0xf7   : > { %v440_v47 = vadd.f32 %v439_v45, %v437_v42  ;;  %v438_v48 = vmul.f32 %v902_v46, %v436_v44 }
  0xf9   : > { %v441_v49 = vrot.slane %v440_v47, 2  ;;  %v445_v50 = vrot.slane %v438_v48, 4 }
  0xfb   : > { %v442_v51 = vadd.f32 %v441_v49, %v440_v47  ;;  %v446_v52 = vadd.f32 %v445_v50, %v438_v48 }
  0xfd   : > { %v447_v53 = vrot.slane %v446_v52, 2  ;;  %v443_v54 = vrot.slane %v442_v51, 1 }
  0xff   : > { %v448_v19 = vadd.f32 %v447_v53, %v446_v52  ;;  %v444_v56 = vadd.f32 %v443_v54, %v442_v51 }
 0x101   : > { %v449_v55 = vrot.slane %v448_v19, 1 }
 0x103   : > { %v450_v57 = vadd.f32 %v449_v55, %v448_v19 }
 0x105   : > { %v474_v58 = vsel %vm388_vm0, %v450_v57, %v444_v56 }
 0x106   : > { %967 = vmatmul.mubr.f32.vlgmr.msra.gmra.mrb[0].mxu0 %v474_v58 }
 0x107   : > { %971 = vmatprep.mubr.msk.f32.mxu0 %vm1356_vm1, %v1355_v27 }
 0x12e   : > { %v454_v1 = vpop.xlane.xlu0 %453 }
 0x12f   : > { %v455_v2 = vmax.f32 %v454_v1, 1.0 }
 0x131   : > { %1124 = vrcp.f32 %v455_v2 }
 0x132   : > { %1126 = vpow2.f32 %v687_v24 }
 0x13b   : > { %v1125_v3 = vpop.eup %1124 }
 0x13c   : > { %v1127_v25 = vpop.eup %1126 }
 0x13d   : > { %1030 = vpush %v1127_v25 }
 0x16e   : > { %s1031_s18 = spop %1030 }
 0x16f   : > { %s690_s22 = smin.f32 %s1357_s19, %s1031_s18 }
 0x170   : > { %v764_v29 = vstv %s690_s22 }
 0x1d9   : > { %v542_v5 = vpop.f32.mrb[0].mxu0 }
 0x1da   : > { %v547_v6 = vmul.f32 %v1125_v3, %v542_v5  ;;  %v968_v7 = vpop.f32.mrb[1].mxu0 }
 0x1dc   : > { %v549_v9 = vrot.slane %v547_v6, 6 }
 0x1de   : > { %v552_v27 = vsel %vm551_vm5, %v398_v8, %v549_v9 }
 0x1df   : > { %662 = vmatmul.mubr.f32.vlgmr.msra.gmra.mrb[0].mxu1 %v552_v27 }
 0x2b2   : > { %v663_v13 = vpop.f32.mrb[0].mxu1 }
 0x2b3   : > { %v664_v14 = vadd.f32 %v663_v13, %v590_v11  ;;  %v665_v15 = vpop.f32.mrb[1].mxu1 }
 0x2b4   : > { %v666_v16 = vadd.f32 %v665_v15, %v594_v12 }
 0x2b5   : > { %v668_v17 = vmul.f32 %v664_v14, %v664_v14 }
 0x2b6   : > { %v675_v18 = vmul.f32 %v666_v16, %v666_v16 }
 0x2b7   : > { %v669_v20 = vsel %vm551_vm5, %v668_v17, 0.0 }
 0x2b8   : > { %670 = vadd.xlane.f32.xlu0 %v669_v20  ;;  %v677_v22 = vsel %vm676_vm6, %v675_v18, 0.0 }
 0x2b9   : > { %678 = vadd.xlane.f32.xlu1 %v677_v22 }
 0x345   : > { %v671_v30 = vpop.xlane.xlu0 %670 }
 0x346   : > { %v672_v26 = vmax.f32 %v671_v30, 1e-24  ;;  %v679_v31 = vpop.xlane.xlu1 %678 }
 0x347   : > { %v680_v28 = vmax.f32 %v679_v31, 1e-24 }
 0x348   : > { %1128 = vrsqrt.f32 %v672_v26 }
 0x349   : > { %1130 = vrsqrt.f32 %v680_v28 }
 0x352   : > { %v1129_v32 = vpop.eup %1128 }
 0x353   : > { %v1131_v21 = vpop.eup %1130  ;;  %v674_v33 = vmul.f32 %v1129_v32, %v664_v14 }
 0x354   : > { %v682_v34 = vmul.f32 %v1131_v21, %v666_v16 }
 0x355   : > { %683 = vst [vmem:[#allocation10] sm:$0x3] %v674_v33 }
 0x356   : > { %684 = vst [vmem:[#allocation11 - $0x2] sm:$0xc] %v682_v34  ;;  %v692_v35 = vrot.slane %v682_v34, 2 }
 0x358   : > { %970 = vmatpush3.xpose.msra.mxu0 %v692_v35 }
 0x35b   : > { %972 = vmatmul.mubr.f32.vlgmr.msra.gmra.mrb[2].mxu0 %v674_v33 }
 0x42e   : > { %v760_v36 = vpop.f32.mrb[2].mxu0 }
 0x42f   : > { %v765_v37 = vmul.f32 %v764_v29, %v760_v36  ;;  %v973_v38 = vpop.f32.mrb[3].mxu0 }
 0x431   : > { %v767_v39 = vsel %vm766_vm7, %v765_v37, 0.0 }
 0x432   : > { %768 = vst [vmem:[#allocation13] sm:$0x3] %v767_v39 }
 0x433 PF: > { %p1070_p4 = scmp.eq.s32.totalorder %s1433_s0, 3  ;;  %s1358_s26 = smov [#allocation11]  }
 0x434   : > { %s787_s27 = sshll.u32 %s1358_s26, 4  ;;  %s1359_s29 = smov [#allocation10]   ;;  %s788_s27 = int_to_ptr.vmem [resolvable:$true] %s787_s27 }
 0x435   : > { %s776_s30 = sshll.u32 %s1359_s29, 4  ;;  %s1218_s11 = scalar_lea.vmem %s788_s27, 32  ;;  %s777_s30 = int_to_ptr.vmem [resolvable:$true] %s776_s30 }
 0x436   : > { %p1219_p7 = scmp.ne.s32.totalorder %s788_s27, %s1218_s11  ;;  %p1225_p12 = scmp.lt.s32.totalorder %s788_s27, %s788_s27 }
 0x437   : > { %p1226_p8 = scmp.lt.s32.totalorder %s1218_s11, %s1218_s11 }
 0x438   : > { %p1220_p11 = pnand %p1219_p7, %p1070_p4 }
 0x439   : > { %p1227_p10 = por %p1226_p8, %p1225_p12 }
 0x43a   : > { %p1221_p13 = pneg %p1220_p11 }
 0x43c   : > { %p1228_p0 = pnand %p1227_p10, %p1221_p13 }
 0x43e   : > { %1231 = shalt.err (!%p1228_p0)
}
 0x43f   : > { %s1232_s28 = scalar_lea.hbm %s1705_s8, 32 }
 0x440   : > { %p1233_p5 = scmp.ne.s32.totalorder %s1705_s8, %s1232_s28  ;;  %p1238_p3 = scmp.lt.u32.totalorder %s1232_s28, %s1705_s8 }
 0x442   : > { %p1234_p9 = pnand %p1233_p5, %p1070_p4 }
 0x444   : > { %p1235_p1 = pneg %p1234_p9 }
 0x446   : > { %p1240_p2 = pnand %p1238_p3, %p1235_p1 }
 0x448   : > { %1243 = shalt.err (!%p1240_p2)
}
 0x449   : > { %1045 = dma.vmem_to_hbm [thread:$0]  (%p1070_p4), %s788_s27, 32, %s1705_s8, [#allocation12]  }
 0x44a   : > { %s1244_s24 = scalar_lea.vmem %s777_s30, 32  ;;  %p1251_p13 = scmp.lt.s32.totalorder %s777_s30, %s777_s30 }
 0x44b   : > { %p1245_p6 = scmp.ne.s32.totalorder %s777_s30, %s1244_s24  ;;  %p1252_p12 = scmp.lt.s32.totalorder %s1244_s24, %s1244_s24 }
 0x44d   : > { %p1246_p7 = pnand %p1245_p6, %p1070_p4  ;;  %p1253_p8 = por %p1252_p12, %p1251_p13 }
 0x44f   : > { %p1247_p11 = pneg %p1246_p7 }
 0x451   : > { %p1254_p10 = pnand %p1253_p8, %p1247_p11 }
 0x453   : > { %1257 = shalt.err (!%p1254_p10)
}
 0x454   : > { %s1258_s19 = scalar_lea.hbm %s1704_s7, 32 }
 0x455   : > { %p1259_p0 = scmp.ne.s32.totalorder %s1704_s7, %s1258_s19  ;;  %p1264_p1 = scmp.lt.u32.totalorder %s1258_s19, %s1704_s7 }
 0x457   : > { %p1260_p5 = pnand %p1259_p0, %p1070_p4 }
 0x459   : > { %p1261_p9 = pneg %p1260_p5 }
 0x45b   : > { %p1266_p3 = pnand %p1264_p1, %p1261_p9 }
 0x45d   : > { %1269 = shalt.err (!%p1266_p3)
}
 0x45e   : > { %1043 = dma.vmem_to_hbm [thread:$0]  (%p1070_p4), %s777_s30, 32, %s1704_s7, [#allocation6]  }
 0x45f   : > { %s1360_s14 = smov [#allocation13]  }
 0x460   : > { %s798_s28 = sshll.u32 %s1360_s14, 4  ;;  %s799_s28 = int_to_ptr.vmem [resolvable:$true] %s798_s28 }
 0x461   : > { %s1270_s15 = scalar_lea.vmem %s799_s28, 32  ;;  %p1277_p11 = scmp.lt.s32.totalorder %s799_s28, %s799_s28 }
 0x462   : > { %p1271_p2 = scmp.ne.s32.totalorder %s799_s28, %s1270_s15  ;;  %p1278_p13 = scmp.lt.s32.totalorder %s1270_s15, %s1270_s15 }
 0x464   : > { %p1272_p6 = pnand %p1271_p2, %p1070_p4  ;;  %p1279_p12 = por %p1278_p13, %p1277_p11 }
 0x466   : > { %p1273_p7 = pneg %p1272_p6 }
 0x468   : > { %p1280_p8 = pnand %p1279_p12, %p1273_p7 }
 0x46a   : > { %1283 = shalt.err (!%p1280_p8)
}
 0x46b   : > { %s1284_s25 = scalar_lea.hbm %s1706_s9, 32 }
 0x46c   : > { %p1285_p10 = scmp.ne.s32.totalorder %s1706_s9, %s1284_s25  ;;  %p1290_p9 = scmp.lt.u32.totalorder %s1284_s25, %s1706_s9 }
 0x46e   : > { %p1286_p0 = pnand %p1285_p10, %p1070_p4 }
 0x470   : > { %p1287_p5 = pneg %p1286_p0 }
 0x472   : > { %p1292_p1 = pnand %p1290_p9, %p1287_p5 }
 0x474   : > { %1295 = shalt.err (!%p1292_p1)
}
 0x475   : > { %1047 = dma.vmem_to_hbm [thread:$0]  (%p1070_p4), %s799_s28, 32, %s1706_s9, [#allocation12]  }
 0x476   : > { %1321 = dma.done.wait (%p1070_p4), [#allocation6], 32  }
 0x477   : > { %1323 = vsyncadd (%p1070_p4), [#allocation6], 4294967264 }
 0x478   : > { %1325 = dma.done.wait (%p1070_p4), [#allocation12], 64  }
 0x479   : > { %1327 = vsyncadd (%p1070_p4), [#allocation12], 4294967232 }
 0x47a PF: > { %s1726_s14 = sld [smem:[#allocation18_spill]]  ;;  %s1727_s19 = sld [smem:[#allocation19_spill]] }
 0x47b   : > { %s1728_s11 = smov %s1334_s12  ;;  %s1729_s12 = smov %s1338_s13 }
 0x480   : > { %p24_p3 = scmp.ge.s32.totalorder %s1726_s14, 6   ;;  %s1730_s13 = smov %s1727_s19 }
 0x482   :  { %26 = sbr.rel (!%p24_p3) target bundleno = 8 (0x8), region = 117 }
 0x489   :  { %819 = vsyncpa [#allocation5], 1 }
 0x48a   :  { %821 = vsyncpa [#allocation5 + $0x1], 1 }
 0x48b   :  { %822 = vsyncpa [#allocation8], 1 }
 0x48c   :  { %823 = vsyncpa [#allocation6], 1 }
 0x48d   :  { %825 = vsyncpa [#allocation6 + $0x1], 1 }
 0x48e   :  { %826 = vsyncpa [#allocation12], 1 }

</bundles_post_ra>
